<compile_context>
chip_gen: v7x
topology: tpu7x:2x2x1
jax: 0.10.0
libtpu: 0.0.40
codegen_flags: <defaults>
</compile_context>

<pallas_src>
import math
import jax
import jax.numpy as jnp
from jax.experimental import pallas as pl
from jax.experimental.pallas import tpu as pltpu


# ----------------------------- kernel ---------------------------------------

def _adapt_kernel(x_ref, w_ref, b_ref, o_ref):
    # x_ref: (1, tm, Ds)   input dtype (f32/bf16) -- cast to bf16 in-kernel
    # w_ref: (1, Ds, tn)   bf16 (pre-transposed, lane-padded)
    # b_ref: (1, 1,  tn)   bf16
    # o_ref: (1, tm, tn)   bf16
    x = x_ref[0].astype(jnp.bfloat16)
    acc = jnp.dot(x, w_ref[0], preferred_element_type=jnp.float32)   # MXU, f32 acc
    acc = acc + b_ref[0].astype(jnp.float32)
    o_ref[0] = acc.astype(o_ref.dtype)


# --------------------------- sizing helpers ----------------------------------

def _round_up(x, m):
    return ((x + m - 1) // m) * m


def _vmem_budget_bytes():
    """Generation-aware VMEM budget (~75% of per-core VMEM)."""
    try:
        cap = int(pltpu.get_tpu_info().vmem_capacity_bytes)
    except Exception:
        cap = 64 << 20            # conservative default = v7x per-core VMEM
    return max((cap * 3) // 4, 32 << 20)


def _choose_tn(Ds, Dtp, budget, w_bufs):
    """Largest lane-aligned divisor of Dtp whose (buffered) weight+bias block
    fits in ~1/3 of the VMEM budget."""
    w_budget = max(budget // 3, 1 << 20)
    cands = [Dtp // nn for nn in range(1, Dtp // 128 + 1)
             if Dtp % nn == 0 and (Dtp // nn) % 128 == 0]
    for tn in cands:                               # descending
        if w_bufs * (Ds + 1) * tn * 2 <= w_budget:
            return tn
    return cands[-1] if cands else Dtp


def _choose_tm(M, Ds, tn, x_bytes, budget, w_bufs):
    """Row-tile size: double-buffered x/out tiles + resident weight block fit
    the budget; snapped to 256 (full MXU passes) or 16 (bf16 sublane pack)."""
    weight_bytes = w_bufs * (Ds + 1) * tn * 2
    avail = max(budget - weight_bytes - (2 << 20), 2 << 20)
    per_row = 2 * Ds * x_bytes + 2 * tn * 2        # x tile + out tile, x2 buffers
    tm = min(max(int(avail // per_row), 16), 2048)
    if tm >= 256:
        tm = (tm // 256) * 256
    else:
        tm = max((tm // 16) * 16, 16)
    full = _round_up(M, 16)
    if full <= tm:
        tm = full                                  # single, aligned M tile
    return int(tm)


# ----------------------------- pallas wrapper ---------------------------------

def _adaptation_call(x_slab, w_slab, b_slab, budget, single_buffer_weights):
    L, M, Ds = x_slab.shape
    Dtp = w_slab.shape[-1]
    x_bytes = jnp.dtype(x_slab.dtype).itemsize
    w_bufs = 1 if single_buffer_weights else 2

    tn = _choose_tn(Ds, Dtp, budget, w_bufs)
    tm = _choose_tm(M, Ds, tn, x_bytes, budget, w_bufs)
    n_n = Dtp // tn
    n_m = pl.cdiv(M, tm)                           # ragged last tile, no HBM pad pass

    w_kw = dict(pipeline_mode=pl.Buffered(1)) if single_buffer_weights else {}

    return pl.pallas_call(
        _adapt_kernel,
        out_shape=jax.ShapeDtypeStruct((L, M, Dtp), jnp.bfloat16),
        grid_spec=pltpu.PrefetchScalarGridSpec(
            num_scalar_prefetch=0,
            grid=(L, n_n, n_m),                    # M innermost: weight stays resident
            in_specs=[
                pl.BlockSpec((1, tm, Ds), lambda l, n, m: (l, m, 0)),
                pl.BlockSpec((1, Ds, tn), lambda l, n, m: (l, 0, n), **w_kw),
                pl.BlockSpec((1, 1, tn), lambda l, n, m: (l, 0, n), **w_kw),
            ],
            out_specs=pl.BlockSpec((1, tm, tn), lambda l, n, m: (l, m, n)),
        ),
        compiler_params=pltpu.CompilerParams(
            dimension_semantics=("parallel", "parallel", "parallel"),
            vmem_limit_bytes=int(budget),
        ),
        cost_estimate=pl.CostEstimate(
            flops=2 * L * M * Ds * Dtp,
            transcendentals=0,
            bytes_accessed=int(L * M * Ds * x_bytes + L * (Ds + 1) * Dtp * 2
                               + L * M * Dtp * 2),
        ),
    )(x_slab, w_slab, b_slab)


def multi_layer_adaptation(x_slab, w_slab, b_slab, out_dim=None):
    """x_slab: [L, M, Ds] (any float dtype), w_slab: [L, Ds, Dtp] bf16,
    b_slab: [L, 1, Dtp] bf16  ->  [L, M, out_dim] bf16."""
    L, M, Ds = x_slab.shape
    Dtp = w_slab.shape[-1]
    out_dim = Dtp if out_dim is None else out_dim
    budget = _vmem_budget_bytes()

    # Single-buffer the weight block only when double-buffering it would eat a
    # big chunk of VMEM (typical v7x case); it changes only at (l, n)
    # boundaries so the one exposed DMA is amortized over all M tiles.
    want_single = 2 * (Ds + 1) * Dtp * 2 > budget // 3
    try:
        out = _adaptation_call(x_slab, w_slab, b_slab, budget, want_single)
    except Exception:
        if not want_single:
            raise
        # Fallback: default double-buffered specs (smaller tn picked inside).
        out = _adaptation_call(x_slab, w_slab, b_slab, budget, False)

    if out_dim != Dtp:
        out = out[..., :out_dim]
    return out


# ----------------------- module-equivalent plumbing --------------------------

def create_layer_mapping(num_student_layers, num_teacher_layers):
    # Metadata only (mirrors the PyTorch module); not used in forward compute.
    return {i: round(i * (num_teacher_layers - 1) / (num_student_layers - 1))
            for i in range(num_student_layers)}


def init_params(key, num_student_layers, student_dim, teacher_dim):
    """Deterministic init mimicking torch.nn.Linear default (U(-k, k), k=1/sqrt(in)).
    Weights are stored torch-style as [out, in], bf16."""
    k = 1.0 / math.sqrt(student_dim)
    keys = jax.random.split(key, 2 * num_student_layers)
    weights, biases = [], []
    for i in range(num_student_layers):
        w = jax.random.uniform(keys[2 * i], (teacher_dim, student_dim),
                               minval=-k, maxval=k, dtype=jnp.float32)
        b = jax.random.uniform(keys[2 * i + 1], (teacher_dim,),
                               minval=-k, maxval=k, dtype=jnp.float32)
        weights.append(w.astype(jnp.bfloat16))
        biases.append(b.astype(jnp.bfloat16))
    return weights, biases


def prepare_params(weights, biases):
    """One-time packing of torch-style Linear params into kernel slabs:
    transpose to [L, Ds, Dt], cast bf16, and pad Dt up to a multiple of 128
    (lane-dense, unmasked output stores). Done once at init, NOT per call."""
    Dt, Ds = weights[0].shape
    Dtp = _round_up(Dt, 128)
    w_slab = jnp.stack([w.T.astype(jnp.bfloat16) for w in weights], axis=0)         # [L, Ds, Dt]
    b_slab = jnp.stack([b.reshape(1, -1).astype(jnp.bfloat16) for b in biases], 0)  # [L, 1, Dt]
    if Dtp != Dt:
        w_slab = jnp.pad(w_slab, ((0, 0), (0, 0), (0, Dtp - Dt)))
        b_slab = jnp.pad(b_slab, ((0, 0), (0, 0), (0, Dtp - Dt)))
    return w_slab, b_slab, Dt


def forward(student_hidden_states, w_slab, b_slab, teacher_dim):
    """Matches the torch module: a list/tuple of [B, S, Ds] arrays returns a
    list of [B, S, teacher_dim] bf16 arrays (one pallas_call per layer, no
    jnp.stack slab copy).  A pre-stacked [L, B, S, Ds] array returns
    [n, B, S, teacher_dim] bf16 in a single fused call.
    TODO(synk): have the student model emit bf16 hidden states so the
    in-kernel cast (and half the HBM read) becomes a no-op."""
    n_proj = w_slab.shape[0]
    if isinstance(student_hidden_states, (list, tuple)):
        outs = []
        for i, hs in enumerate(student_hidden_states):
            if i >= n_proj:
                break
            B, S, Ds = hs.shape
            o = multi_layer_adaptation(hs.reshape(1, B * S, Ds),
                                       w_slab[i:i + 1], b_slab[i:i + 1],
                                       out_dim=teacher_dim)
            outs.append(o.reshape(B, S, teacher_dim))
        return outs
    L_hs, B, S, Ds = student_hidden_states.shape
    n = min(L_hs, n_proj)
    x_slab = student_hidden_states[:n].reshape(n, B * S, Ds)       # free reshape
    out = multi_layer_adaptation(x_slab, w_slab[:n], b_slab[:n], out_dim=teacher_dim)
    return out.reshape(n, B, S, teacher_dim)


# ------------------------------- demo ----------------------------------------

if __name__ == "__main__":
    # Small, deterministic example shapes.
    B, S = 2, 8
    student_dim, teacher_dim = 32, 64
    num_student_layers, num_teacher_layers = 4, 12

    key = jax.random.PRNGKey(0)
    kp, kx = jax.random.split(key)

    weights, biases = init_params(kp, num_student_layers, student_dim, teacher_dim)
    w_slab, b_slab, _dt = prepare_params(weights, biases)           # hoisted, once
    layer_mapping = create_layer_mapping(num_student_layers, num_teacher_layers)

    # List of per-layer hidden states (same signature as the torch module).
    student_hidden_states = [
        jax.random.normal(k, (B, S, student_dim), dtype=jnp.float32)
        for k in jax.random.split(kx, num_student_layers)
    ]

    # List path: one pallas_call per layer (no jnp.stack slab copy).
    outs = forward(student_hidden_states, w_slab, b_slab, teacher_dim)
    outs = jax.block_until_ready(outs)

    # Pre-stacked path: single fused call over all layers.
    stacked = jnp.stack(student_hidden_states, axis=0)
    outs_stacked = jax.block_until_ready(forward(stacked, w_slab, b_slab, teacher_dim))

    # Reference check in plain JAX (same bf16 semantics as the torch module).
    for i in range(num_student_layers):
        xb = student_hidden_states[i].astype(jnp.bfloat16)
        ref = (jnp.dot(xb, weights[i].T.astype(jnp.bfloat16),
                       preferred_element_type=jnp.float32)
               + biases[i].astype(jnp.float32)).astype(jnp.bfloat16)
        for o in (outs[i], outs_stacked[i]):
            assert o.shape == (B, S, teacher_dim) and o.dtype == jnp.bfloat16
            assert jnp.allclose(o.astype(jnp.float32), ref.astype(jnp.float32),
                                atol=2e-2, rtol=2e-2), f"mismatch at layer {i}"

    print("KERNEL_OK")
</pallas_src>

<mosaic_0001>
module attributes {stable_mosaic.version = 11 : i64} {
  func.func @_adapt_kernel(%arg0: i32, %arg1: i32, %arg2: i32, %arg3: memref<1x16x32xf32, #tpu.memory_space<vmem>>, %arg4: memref<1x32x128xbf16, #tpu.memory_space<vmem>>, %arg5: memref<1x1x128xbf16, #tpu.memory_space<vmem>>, %arg6: memref<1x16x128xbf16, #tpu.memory_space<vmem>>) attributes {dimension_semantics = [#tpu.dimension_semantics<parallel>, #tpu.dimension_semantics<parallel>, #tpu.dimension_semantics<parallel>], iteration_bounds = array<i64: 1, 1, 1>, scalar_prefetch = 0 : i64, scratch_operands = 0 : i64, tpu.core_type = #tpu.core_type<tc>, window_params = [{transform_indices = @transform_0, window_bounds = array<i64: 1, 16, 32>}, {transform_indices = @transform_1, window_bounds = array<i64: 1, 32, 128>}, {transform_indices = @transform_2, window_bounds = array<i64: 1, 1, 128>}, {transform_indices = @transform_3, window_bounds = array<i64: 1, 16, 128>}]} {
    %c0 = arith.constant 0 : index
    %c0_0 = arith.constant 0 : index
    %c0_1 = arith.constant 0 : index
    %0 = vector.load %arg3[%c0, %c0_0, %c0_1] : memref<1x16x32xf32, #tpu.memory_space<vmem>>, vector<1x16x32xf32>
    %1 = vector.shape_cast %0 : vector<1x16x32xf32> to vector<16x32xf32>
    %2 = arith.truncf %1 : vector<16x32xf32> to vector<16x32xbf16>
    %c0_2 = arith.constant 0 : index
    %c0_3 = arith.constant 0 : index
    %c0_4 = arith.constant 0 : index
    %3 = vector.load %arg4[%c0_2, %c0_3, %c0_4] : memref<1x32x128xbf16, #tpu.memory_space<vmem>>, vector<1x32x128xbf16>
    %4 = vector.shape_cast %3 : vector<1x32x128xbf16> to vector<32x128xbf16>
    %cst = arith.constant dense<0.000000e+00> : vector<16x128xf32>
    %5 = tpu.matmul %2, %4, %cst {dimension_numbers = #tpu.dot_dimension_numbers<[1], [0], [0], [1], [0, 0, 1, 1], [], []>} : vector<16x32xbf16>, vector<32x128xbf16>, vector<16x128xf32> -> vector<16x128xf32>
    %c0_5 = arith.constant 0 : index
    %c0_6 = arith.constant 0 : index
    %c0_7 = arith.constant 0 : index
    %6 = vector.load %arg5[%c0_5, %c0_6, %c0_7] : memref<1x1x128xbf16, #tpu.memory_space<vmem>>, vector<1x1x128xbf16>
    %7 = vector.shape_cast %6 : vector<1x1x128xbf16> to vector<1x128xbf16>
    %8 = arith.extf %7 : vector<1x128xbf16> to vector<1x128xf32>
    %9 = vector.broadcast %8 : vector<1x128xf32> to vector<16x128xf32>
    %10 = arith.addf %5, %9 : vector<16x128xf32>
    %11 = arith.truncf %10 : vector<16x128xf32> to vector<16x128xbf16>
    %c0_8 = arith.constant 0 : index
    %c0_9 = arith.constant 0 : index
    %c0_10 = arith.constant 0 : index
    %12 = vector.load %arg6[%c0_8, %c0_9, %c0_10] : memref<1x16x128xbf16, #tpu.memory_space<vmem>>, vector<1x16x128xbf16>
    %13 = vector.shape_cast %12 : vector<1x16x128xbf16> to vector<16x128xbf16>
    %14 = vector.shape_cast %11 : vector<16x128xbf16> to vector<1x16x128xbf16>
    tpu.vector_store %arg6[%c0_8, %c0_9, %c0_10], %14 {strides = array<i32>} : memref<1x16x128xbf16, #tpu.memory_space<vmem>>, vector<1x16x128xbf16>,
    return
  }
  func.func @transform_0(%arg0: i32, %arg1: i32, %arg2: i32) -> (i32, i32, i32) {
    %c0_i32 = arith.constant 0 : i32
    %c0_i32_0 = arith.constant 0 : i32
    return %arg0, %arg2, %c0_i32 : i32, i32, i32
  }
  func.func @transform_1(%arg0: i32, %arg1: i32, %arg2: i32) -> (i32, i32, i32) {
    %c0_i32 = arith.constant 0 : i32
    %c0_i32_0 = arith.constant 0 : i32
    return %arg0, %c0_i32, %arg1 : i32, i32, i32
  }
  func.func @transform_2(%arg0: i32, %arg1: i32, %arg2: i32) -> (i32, i32, i32) {
    %c0_i32 = arith.constant 0 : i32
    %c0_i32_0 = arith.constant 0 : i32
    return %arg0, %c0_i32, %arg1 : i32, i32, i32
  }
  func.func @transform_3(%arg0: i32, %arg1: i32, %arg2: i32) -> (i32, i32, i32) {
    %c0_i32 = arith.constant 0 : i32
    return %arg0, %arg2, %arg1 : i32, i32, i32
  }
}

</mosaic_0001>

<bundles_post_ra>
// kernel: tpu_custom_call.1
= control target key start
LH: loop header
LB: loop body
LE: loop exit
PB: predicated region body
PF: predicated region fallthrough
CT: control target
= control target key end

     0   :  { %8 = vsyncpa [#allocation3], 0  ;;  %s322_s0 = inlined_call_operand.hbm [shape: f32[1,16,32], index: 0, kind: input, shape index: {}]   ;;  %s323_s1 = inlined_call_operand.hbm [shape: bf16[1,32,128], index: 1, kind: input, shape index: {}]   ;;  %s324_s2 = inlined_call_operand.vmem [shape: bf16[1,1,128], index: 2, kind: input, shape index: {}]   ;;  %s325_s3 = inlined_call_operand.hbm [shape: bf16[1,16,128], index: 3, kind: output, shape index: {}]  }
   0x1   :  { %9 = vsyncpa [#allocation6], 0 }
   0x2   :  { %10 = vsyncpa [#allocation4], 0  ;;  %s248_s12 = smov [#allocation2]   ;;  %s176_s16 = scalar_lea.hbm %s322_s0, 256 }
   0x3   :  { %s16_s13 = sshll.u32 %s248_s12, 4  ;;  %p177_p0 = scmp.ne.s32.totalorder %s322_s0, %s176_s16  ;;  %s17_s13 = int_to_ptr.vmem [resolvable:$true] %s16_s13 }
   0x4   :  { %p180_p1 = scmp.lt.u32.totalorder %s176_s16, %s322_s0 }
   0x6   :  { %p182_p2 = pnand %p180_p1, %p177_p0 }
   0x8   :  { %185 = shalt.err (!%p182_p2)
}
   0x9   :  { %s186_s21 = scalar_lea.vmem %s17_s13, 256  ;;  %p191_p4 = scmp.lt.s32.totalorder %s17_s13, %s17_s13 }
   0xa   :  { %p187_p3 = scmp.ne.s32.totalorder %s17_s13, %s186_s21  ;;  %p192_p5 = scmp.lt.s32.totalorder %s186_s21, %s186_s21 }
   0xc   :  { %p193_p6 = por %p192_p5, %p191_p4 }
   0xe   :  { %p194_p7 = pnand %p193_p6, %p187_p3 }
  0x10   :  { %197 = shalt.err (!%p194_p7)
}
  0x11   :  { %s249_s22 = smov 128   ;;  %s250_s23 = smov 8  }
  0x12   :  { %22 = dma.hbm_to_vmem [thread:$0]  %s322_s0, 256, %s17_s13, [#allocation3], %s249_s22, %s249_s22, %s250_s23  }
  0x13   :  { %s251_s26 = smov [#allocation5]   ;;  %s198_s30 = scalar_lea.hbm %s323_s1, 256 }
  0x14   :  { %s28_s27 = sshll.u32 %s251_s26, 4  ;;  %p199_p8 = scmp.ne.s32.totalorder %s323_s1, %s198_s30  ;;  %s29_s27 = int_to_ptr.vmem [resolvable:$true] %s28_s27 }
  0x15   :  { %p202_p9 = scmp.lt.u32.totalorder %s198_s30, %s323_s1 }
  0x17   :  { %p204_p10 = pnand %p202_p9, %p199_p8 }
  0x19   :  { %207 = shalt.err (!%p204_p10)
}
  0x1a   :  { %s208_s8 = scalar_lea.vmem %s29_s27, 256  ;;  %p213_p12 = scmp.lt.s32.totalorder %s29_s27, %s29_s27 }
  0x1b   :  { %p209_p11 = scmp.ne.s32.totalorder %s29_s27, %s208_s8  ;;  %p214_p13 = scmp.lt.s32.totalorder %s208_s8, %s208_s8 }
  0x1d   :  { %p215_p0 = por %p214_p13, %p213_p12 }
  0x1f   :  { %p216_p1 = pnand %p215_p0, %p209_p11 }
  0x21   :  { %219 = shalt.err (!%p216_p1)
}
  0x22   :  { %s252_s0 = smov 64   ;;  %s253_s9 = smov 4  }
  0x23   :  { %34 = dma.hbm_to_vmem [thread:$0]  %s323_s1, 256, %s29_s27, [#allocation6], %s252_s0, %s252_s0, %s253_s9  }
  0x24   :  { %242 = dma.done.wait [#allocation3], 256  }
  0x25   :  { %243 = vsyncadd [#allocation3], 4294967040 }
  0x26   :  { %244 = dma.done.wait [#allocation6], 256  }
  0x27   :  { %245 = vsyncadd [#allocation6], 4294967040  ;;  %v254_v0 = vmov 0.0   ;;  %vm255_vm0 = vmmov 0   ;;  %v174_v1 = vld [vmem:[#allocation5] sm:$0xff]   ;;  %v175_v2 = vld [vmem:[#allocation5 + $0x8] sm:$0xff]   ;;  %v53_v6 = vlaneseq }
  0x28   :  { %157 = vmatprep.subr.bf16.mxu0 %v254_v0  ;;  %161 = vmatprep.mubr.msk.bf16.mxu0 %vm255_vm0, %v254_v0  ;;  %v44_v3 = vld [vmem:[#allocation2] sm:$0xff]  ;;  %v45_v4 = vld [vmem:[#allocation2 + $0x8] sm:$0xff]  ;;  %vm69_vm1 = vcmask 261120   ;;  %s256_s13 = smov [#allocation7]  }
  0x29   :  { %158 = vmatpush3.bf16.msra.mxu0 %v174_v1  ;;  %v46_v5 = vpack.c.bf16 %v45_v4, %v44_v3  ;;  %v54_v7 = vshrl.u32 %v53_v6, 7  ;;  %v51_v8 = vld [vmem:[%s324_s2] sm:$0x1]  ;;  %s129_s14 = sshll.u32 %s256_s13, 4  ;;  %s130_s14 = int_to_ptr.vmem [resolvable:$true] %s129_s14 }
  0x2a   :  { %159 = vmatprep.subr.bf16.mxu0 %v254_v0  ;;  %v52_v9 = vunpack.c.l.bf16 %v51_v8  ;;  %s220_s15 = scalar_lea.vmem %s130_s14, 128  ;;  %p225_p3 = scmp.lt.s32.totalorder %s130_s14, %s130_s14 }
  0x2b   :  { %v55_v10 = vsub.s32 0, %v54_v7  ;;  %p221_p2 = scmp.ne.s32.totalorder %s130_s14, %s220_s15  ;;  %p226_p4 = scmp.lt.s32.totalorder %s220_s15, %s220_s15 }
  0x2d   :  { %160 = vmatpush3.bf16.msra.mxu0 %v175_v2  ;;  %v56_v11 = vrot.slane %v52_v9, %v55_v10  ;;  %p227_p5 = por %p226_p4, %p225_p3 }
  0x2f   :  { %p228_p6 = pnand %p227_p5, %p221_p2 }
  0x30   :  { %162 = vmatmul.mubr.msk.bf16.vlgmr.msra.gmra.mrb[0].mxu0 %vm69_vm1, %v46_v5 }
 0x103   :  { %v107_v12 = vpop.f32.mrb[0].mxu0 }
 0x104   :  { %v163_v13 = vpop.f32.mrb[1].mxu0  ;;  %v108_v15 = vadd.f32 %v107_v12, %v56_v11 }
 0x105   :  { %v110_v14 = vpop.f32.mrb[2].mxu0 }
 0x106   :  { %v111_v16 = vadd.f32 %v110_v14, %v56_v11  ;;  %v164_v17 = vpop.f32.mrb[3].mxu0 }
 0x108   :  { %v152_v18 = vpack.c.bf16 %v111_v16, %v108_v15 }
 0x10a   :  { %153 = vst [vmem:[#allocation7] sm:$0xff] %v152_v18  }
 0x10b   :  { %231 = shalt.err (!%p228_p6)
}
 0x10c   :  { %s232_s17 = scalar_lea.hbm %s325_s3, 128 }
 0x10d   :  { %p233_p7 = scmp.ne.s32.totalorder %s325_s3, %s232_s17  ;;  %p236_p8 = scmp.lt.u32.totalorder %s232_s17, %s325_s3 }
 0x10f   :  { %p238_p9 = pnand %p236_p8, %p233_p7 }
 0x111   :  { %241 = shalt.err (!%p238_p9)
}
 0x112   :  { %135 = dma.vmem_to_hbm [thread:$0]  %s130_s14, 128, %s325_s3, [#allocation4], %s252_s0, %s252_s0, %s253_s9  }
 0x113   :  { %246 = dma.done.wait [#allocation4], 128  }
 0x114   :  { %247 = vsyncadd [#allocation4], 4294967168 }
 0x115   :  { %139 = vsyncpa [#allocation3], 1 }
 0x116   :  { %140 = vsyncpa [#allocation6], 1 }
 0x117   :  { %141 = vsyncpa [#allocation4], 1 }

</bundles_post_ra>
